<compile_context>
chip_gen: v7x
topology: tpu7x:2x2x1
jax: 0.10.0
libtpu: 0.0.40
codegen_flags: <defaults>
</compile_context>

<pallas_src>
import functools
import math

import jax
import jax.numpy as jnp
from jax.experimental import pallas as pl
from jax.experimental.pallas import tpu as pltpu

_INV_SQRT2 = 1.0 / math.sqrt(2.0)


def _erf(x):
    # Abramowitz & Stegun 7.1.26 rational approximation, |error| < 1.5e-7 (below the
    # f32 noise floor).  Only needs exp / mul / where, all of which lower in Mosaic.
    a1, a2, a3, a4, a5 = 0.254829592, -0.284496736, 1.421413741, -1.453152027, 1.061405429
    p = 0.3275911
    z = jnp.abs(x)
    t = 1.0 / (1.0 + p * z)
    poly = ((((a5 * t + a4) * t + a3) * t + a2) * t + a1) * t
    f = 1.0 - poly * jnp.exp(-z * z)
    return jnp.where(x >= 0.0, f, -f)


def _gelu(x):
    # gelu(x) = x * 0.5 * (1 + erf(x / sqrt(2)))  -- the exact BERT gelu.
    return x * 0.5 * (1.0 + _erf(x * _INV_SQRT2))


def _lm_head_kernel(x_ref, wd_ref, bd_ref, g_ref, b_ref, we_ref, vb_ref,
                    out_ref, t_ref, *, eps):
    # Grid = (row tiles i, vocab tiles j); j is innermost.
    @pl.when(pl.program_id(1) == 0)
    def _():
        # BertPredictionHeadTransform: dense -> gelu -> LayerNorm, all in f32.
        # dense_w is the native nn.Linear (out, in) layout; contract on its dim 1.
        h = jax.lax.dot_general(
            x_ref[...].astype(jnp.float32), wd_ref[...],
            dimension_numbers=(((1,), (1,)), ((), ())),
            preferred_element_type=jnp.float32)
        h = h + bd_ref[...]
        h = _gelu(h)
        mu = jnp.mean(h, axis=-1, keepdims=True)
        var = jnp.mean((h - mu) ** 2, axis=-1, keepdims=True)
        t = (h - mu) * jax.lax.rsqrt(var + eps) * g_ref[...] + b_ref[...]
        # Cache the transform output in bf16 scratch -> full-rate bf16 MXU below.
        t_ref[...] = t.astype(t_ref.dtype)

    # Decoder: tied embedding weight tile in native (tv, H) layout (no transpose),
    # bf16 x bf16 -> f32 accumulation, plus the separate vocab bias.
    logits = jax.lax.dot_general(
        t_ref[...], we_ref[...],
        dimension_numbers=(((1,), (1,)), ((), ())),
        preferred_element_type=jnp.float32)
    out_ref[...] = (logits + vb_ref[...]).astype(out_ref.dtype)


def _round_up(x, m):
    return ((x + m - 1) // m) * m


def _pick_tile(dim, cap, quantum):
    """Largest tile <= cap that is a multiple of quantum and divides dim.

    `dim` is already padded to a multiple of `quantum`, so this always succeeds
    (falls back to `quantum`)."""
    if dim <= cap:
        return dim
    t = (cap // quantum) * quantum
    while t > quantum:
        if dim % t == 0:
            return t
        t -= quantum
    return quantum


def bert_lm_prediction_head(hidden_states, dense_w, dense_b, ln_gamma, ln_beta,
                            decoder_w, decoder_bias, *, eps=1e-12,
                            row_tile=512, vocab_tile=2048,
                            weight_dtype=jnp.bfloat16, out_dtype=None):
    *lead, H = hidden_states.shape
    V, H2 = decoder_w.shape
    assert H2 == H, (decoder_w.shape, H)
    out_dtype = hidden_states.dtype if out_dtype is None else out_dtype

    x = hidden_states.reshape(-1, H)
    M = x.shape[0]

    # ---- tiles + padding (lane/sublane-dense, never a full-V fallback) ----
    tm = min(_round_up(row_tile, 8), _round_up(M, 8))
    M_pad = _round_up(M, tm)

    vq = 512 if V >= 512 else 128
    V_pad = _round_up(V, vq)
    tv = _pick_tile(V_pad, max(vocab_tile, vq), vq)

    if M_pad != M:
        x = jnp.pad(x, ((0, M_pad - M), (0, 0)))

    # Decoder weight kept in its native (V, H) layout -- no HBM transpose.  Only a
    # bf16 cast (do this once at parameter-setup time in production).
    we = decoder_w if decoder_w.dtype == weight_dtype else decoder_w.astype(weight_dtype)
    vb = decoder_bias.astype(jnp.float32)
    if V_pad != V:
        we = jnp.pad(we, ((0, V_pad - V), (0, 0)))
        vb = jnp.pad(vb, ((0, V_pad - V),))
    vb = vb.reshape(1, V_pad)

    # Small (H, H) / (H,) transform params stay f32 (LayerNorm precision), native layout.
    wd = dense_w.astype(jnp.float32)                 # (H_out, H_in)
    bd = dense_b.reshape(1, H).astype(jnp.float32)
    g = ln_gamma.reshape(1, H).astype(jnp.float32)
    b = ln_beta.reshape(1, H).astype(jnp.float32)

    grid = (M_pad // tm, V_pad // tv)
    kernel = functools.partial(_lm_head_kernel, eps=eps)

    out = pl.pallas_call(
        kernel,
        out_shape=jax.ShapeDtypeStruct((M_pad, V_pad), out_dtype),
        grid_spec=pltpu.PrefetchScalarGridSpec(
            num_scalar_prefetch=0,
            grid=grid,
            in_specs=[
                pl.BlockSpec((tm, H), lambda i, j: (i, 0)),    # hidden-state rows
                pl.BlockSpec((H, H), lambda i, j: (0, 0)),     # dense weight (out, in)
                pl.BlockSpec((1, H), lambda i, j: (0, 0)),     # dense bias
                pl.BlockSpec((1, H), lambda i, j: (0, 0)),     # LayerNorm gamma
                pl.BlockSpec((1, H), lambda i, j: (0, 0)),     # LayerNorm beta
                pl.BlockSpec((tv, H), lambda i, j: (j, 0)),    # decoder weight (V, H) tile
                pl.BlockSpec((1, tv), lambda i, j: (0, j)),    # decoder bias tile
            ],
            out_specs=pl.BlockSpec((tm, tv), lambda i, j: (i, j)),
            scratch_shapes=[pltpu.VMEM((tm, H), weight_dtype)],  # cached transform output
        ),
        compiler_params=pltpu.CompilerParams(
            dimension_semantics=("parallel", "arbitrary"),
            vmem_limit_bytes=48 * 1024 * 1024),
    )(x, wd, bd, g, b, we, vb)

    if M_pad != M or V_pad != V:
        out = out[:M, :V]
    return out.reshape(*lead, V)


def _reference(hidden_states, dense_w, dense_b, ln_gamma, ln_beta,
               decoder_w, decoder_bias, eps=1e-12, weight_dtype=jnp.bfloat16):
    # Mirrors the kernel's numerics: f32 transform, bf16-streamed decoder matmul
    # with f32 accumulation.
    hi = jax.lax.Precision.HIGHEST
    x = hidden_states.astype(jnp.float32)
    h = jnp.einsum("...h,oh->...o", x, dense_w.astype(jnp.float32), precision=hi)
    h = h + dense_b
    h = _gelu(h)
    mu = h.mean(-1, keepdims=True)
    var = ((h - mu) ** 2).mean(-1, keepdims=True)
    t = (h - mu) * jax.lax.rsqrt(var + eps) * ln_gamma + ln_beta
    logits = jnp.einsum("...h,vh->...v",
                        t.astype(weight_dtype), decoder_w.astype(weight_dtype),
                        preferred_element_type=jnp.float32)
    return logits + decoder_bias


if __name__ == "__main__":
    # Small shapes; S and V chosen NOT to be tile multiples so the pad/slice path
    # (the one that matters for real V=30522) is exercised.
    B, S, H, V = 2, 7, 32, 250

    key = jax.random.PRNGKey(0)
    ks = jax.random.split(key, 7)
    hidden_states = jax.random.normal(ks[0], (B, S, H), jnp.float32)
    dense_w = 0.02 * jax.random.normal(ks[1], (H, H), jnp.float32)        # (out, in)
    dense_b = 0.02 * jax.random.normal(ks[2], (H,), jnp.float32)
    ln_gamma = 1.0 + 0.1 * jax.random.normal(ks[3], (H,), jnp.float32)
    ln_beta = 0.1 * jax.random.normal(ks[4], (H,), jnp.float32)
    decoder_w = 0.02 * jax.random.normal(ks[5], (V, H), jnp.float32)      # tied embedding (V, H)
    decoder_bias = 0.02 * jax.random.normal(ks[6], (V,), jnp.float32)     # module inits zeros; nonzero to test add

    out = bert_lm_prediction_head(hidden_states, dense_w, dense_b, ln_gamma, ln_beta,
                                  decoder_w, decoder_bias)
    out = jax.block_until_ready(out)

    ref = _reference(hidden_states, dense_w, dense_b, ln_gamma, ln_beta,
                     decoder_w, decoder_bias)
    assert out.shape == (B, S, V), f"bad shape {out.shape}"
    max_err = float(jnp.max(jnp.abs(out.astype(jnp.float32) - ref)))
    assert jnp.allclose(out.astype(jnp.float32), ref, atol=2e-3, rtol=2e-3), \
        f"mismatch vs reference, max|diff|={max_err}"
    print("KERNEL_OK")
</pallas_src>

<mosaic_0001>
module attributes {stable_mosaic.version = 11 : i64} {
  func.func @_lm_head_kernel(%arg0: i32, %arg1: i32, %arg2: memref<16x32xf32, #tpu.memory_space<vmem>>, %arg3: memref<32x32xf32, #tpu.memory_space<vmem>>, %arg4: memref<1x32xf32, #tpu.memory_space<vmem>>, %arg5: memref<1x32xf32, #tpu.memory_space<vmem>>, %arg6: memref<1x32xf32, #tpu.memory_space<vmem>>, %arg7: memref<256x32xbf16, #tpu.memory_space<vmem>>, %arg8: memref<1x256xf32, #tpu.memory_space<vmem>>, %arg9: memref<16x256xf32, #tpu.memory_space<vmem>>, %arg10: memref<16x32xbf16, #tpu.memory_space<vmem>>) attributes {dimension_semantics = [#tpu.dimension_semantics<parallel>, #tpu.dimension_semantics<arbitrary>], iteration_bounds = array<i64: 1, 1>, scalar_prefetch = 0 : i64, scratch_operands = 1 : i64, tpu.core_type = #tpu.core_type<tc>, window_params = [{transform_indices = @transform_0, window_bounds = array<i64: 16, 32>}, {pipeline_mode = #tpu.pipeline_mode<synchronous>, transform_indices = @transform_1, window_bounds = array<i64: 32, 32>}, {pipeline_mode = #tpu.pipeline_mode<synchronous>, transform_indices = @transform_2, window_bounds = array<i64: 1, 32>}, {pipeline_mode = #tpu.pipeline_mode<synchronous>, transform_indices = @transform_3, window_bounds = array<i64: 1, 32>}, {pipeline_mode = #tpu.pipeline_mode<synchronous>, transform_indices = @transform_4, window_bounds = array<i64: 1, 32>}, {transform_indices = @transform_5, window_bounds = array<i64: 256, 32>}, {transform_indices = @transform_6, window_bounds = array<i64: 1, 256>}, {transform_indices = @transform_7, window_bounds = array<i64: 16, 256>}]} {
    %c0_i32 = arith.constant 0 : i32
    %0 = arith.cmpi eq, %arg1, %c0_i32 : i32
    %1 = arith.extui %0 : i1 to i32
    %c0_i32_0 = arith.constant 0 : i32
    %2 = arith.cmpi ne, %1, %c0_i32_0 : i32
    scf.if %2 {
      %c0_8 = arith.constant 0 : index
      %c0_9 = arith.constant 0 : index
      %10 = vector.load %arg2[%c0_8, %c0_9] : memref<16x32xf32, #tpu.memory_space<vmem>>, vector<16x32xf32>
      %c0_10 = arith.constant 0 : index
      %c0_11 = arith.constant 0 : index
      %11 = vector.load %arg3[%c0_10, %c0_11] : memref<32x32xf32, #tpu.memory_space<vmem>>, vector<32x32xf32>
      %cst_12 = arith.constant dense<0.000000e+00> : vector<16x32xf32>
      %12 = tpu.matmul %10, %11, %cst_12 {dimension_numbers = #tpu.dot_dimension_numbers<[1], [1], [0], [0], [0, 0, 1, 0], [], []>} : vector<16x32xf32>, vector<32x32xf32>, vector<16x32xf32> -> vector<16x32xf32>
      %c0_13 = arith.constant 0 : index
      %c0_14 = arith.constant 0 : index
      %13 = vector.load %arg4[%c0_13, %c0_14] : memref<1x32xf32, #tpu.memory_space<vmem>>, vector<1x32xf32>
      %14 = vector.broadcast %13 : vector<1x32xf32> to vector<16x32xf32>
      %15 = arith.addf %12, %14 : vector<16x32xf32>
      %cst_15 = arith.constant 5.000000e-01 : f32
      %16 = vector.broadcast %cst_15 : f32 to vector<16x32xf32>
      %17 = arith.mulf %15, %16 : vector<16x32xf32>
      %cst_16 = arith.constant 0.707106769 : f32
      %18 = vector.broadcast %cst_16 : f32 to vector<16x32xf32>
      %19 = arith.mulf %15, %18 : vector<16x32xf32>
      %20 = math.absf %19 : vector<16x32xf32>
      %cst_17 = arith.constant 0.327591091 : f32
      %21 = vector.broadcast %cst_17 : f32 to vector<16x32xf32>
      %22 = arith.mulf %21, %20 : vector<16x32xf32>
      %cst_18 = arith.constant 1.000000e+00 : f32
      %23 = vector.broadcast %cst_18 : f32 to vector<16x32xf32>
      %24 = arith.addf %23, %22 : vector<16x32xf32>
      %cst_19 = arith.constant 1.000000e+00 : f32
      %25 = vector.broadcast %cst_19 : f32 to vector<16x32xf32>
      %26 = arith.divf %25, %24 : vector<16x32xf32>
      %cst_20 = arith.constant 1.06140542 : f32
      %27 = vector.broadcast %cst_20 : f32 to vector<16x32xf32>
      %28 = arith.mulf %27, %26 : vector<16x32xf32>
      %cst_21 = arith.constant -1.45315206 : f32
      %29 = vector.broadcast %cst_21 : f32 to vector<16x32xf32>
      %30 = arith.addf %28, %29 : vector<16x32xf32>
      %31 = arith.mulf %30, %26 : vector<16x32xf32>
      %cst_22 = arith.constant 1.42141378 : f32
      %32 = vector.broadcast %cst_22 : f32 to vector<16x32xf32>
      %33 = arith.addf %31, %32 : vector<16x32xf32>
      %34 = arith.mulf %33, %26 : vector<16x32xf32>
      %cst_23 = arith.constant -0.284496725 : f32
      %35 = vector.broadcast %cst_23 : f32 to vector<16x32xf32>
      %36 = arith.addf %34, %35 : vector<16x32xf32>
      %37 = arith.mulf %36, %26 : vector<16x32xf32>
      %cst_24 = arith.constant 0.254829586 : f32
      %38 = vector.broadcast %cst_24 : f32 to vector<16x32xf32>
      %39 = arith.addf %37, %38 : vector<16x32xf32>
      %40 = arith.mulf %39, %26 : vector<16x32xf32>
      %cst_25 = arith.constant 0.000000e+00 : f32
      %41 = vector.broadcast %cst_25 : f32 to vector<16x32xf32>
      %42 = arith.subf %41, %20 : vector<16x32xf32>
      %43 = arith.mulf %42, %20 : vector<16x32xf32>
      %44 = math.exp %43 : vector<16x32xf32>
      %45 = arith.mulf %40, %44 : vector<16x32xf32>
      %cst_26 = arith.constant 1.000000e+00 : f32
      %46 = vector.broadcast %cst_26 : f32 to vector<16x32xf32>
      %47 = arith.subf %46, %45 : vector<16x32xf32>
      %cst_27 = arith.constant 0.000000e+00 : f32
      %48 = vector.broadcast %cst_27 : f32 to vector<16x32xf32>
      %49 = arith.cmpf oge, %19, %48 : vector<16x32xf32>
      %cst_28 = arith.constant 0.000000e+00 : f32
      %50 = vector.broadcast %cst_28 : f32 to vector<16x32xf32>
      %51 = arith.subf %50, %47 : vector<16x32xf32>
      %52 = arith.select %49, %47, %51 : vector<16x32xi1>, vector<16x32xf32>
      %cst_29 = arith.constant 1.000000e+00 : f32
      %53 = vector.broadcast %cst_29 : f32 to vector<16x32xf32>
      %54 = arith.addf %53, %52 : vector<16x32xf32>
      %55 = arith.mulf %17, %54 : vector<16x32xf32>
      %cst_30 = arith.constant dense<0.000000e+00> : vector<16xf32>
      %56 = vector.multi_reduction <add>, %55, %cst_30 [1] : vector<16x32xf32> to vector<16xf32>
      %57 = vector.shape_cast %56 : vector<16xf32> to vector<16x1xf32>
      %cst_31 = arith.constant 3.200000e+01 : f32
      %58 = vector.broadcast %cst_31 : f32 to vector<16x1xf32>
      %59 = arith.divf %57, %58 : vector<16x1xf32>
      %60 = vector.broadcast %59 : vector<16x1xf32> to vector<16x32xf32>
      %61 = arith.subf %55, %60 : vector<16x32xf32>
      %62 = arith.mulf %61, %61 : vector<16x32xf32>
      %cst_32 = arith.constant dense<0.000000e+00> : vector<16xf32>
      %63 = vector.multi_reduction <add>, %62, %cst_32 [1] : vector<16x32xf32> to vector<16xf32>
      %64 = vector.shape_cast %63 : vector<16xf32> to vector<16x1xf32>
      %cst_33 = arith.constant 3.200000e+01 : f32
      %65 = vector.broadcast %cst_33 : f32 to vector<16x1xf32>
      %66 = arith.divf %64, %65 : vector<16x1xf32>
      %67 = vector.broadcast %59 : vector<16x1xf32> to vector<16x32xf32>
      %68 = arith.subf %55, %67 : vector<16x32xf32>
      %cst_34 = arith.constant 9.99999996E-13 : f32
      %69 = vector.broadcast %cst_34 : f32 to vector<16x1xf32>
      %70 = arith.addf %66, %69 : vector<16x1xf32>
      %71 = math.rsqrt %70 : vector<16x1xf32>
      %72 = vector.broadcast %71 : vector<16x1xf32> to vector<16x32xf32>
      %73 = arith.mulf %68, %72 : vector<16x32xf32>
      %c0_35 = arith.constant 0 : index
      %c0_36 = arith.constant 0 : index
      %74 = vector.load %arg5[%c0_35, %c0_36] : memref<1x32xf32, #tpu.memory_space<vmem>>, vector<1x32xf32>
      %75 = vector.broadcast %74 : vector<1x32xf32> to vector<16x32xf32>
      %76 = arith.mulf %73, %75 : vector<16x32xf32>
      %c0_37 = arith.constant 0 : index
      %c0_38 = arith.constant 0 : index
      %77 = vector.load %arg6[%c0_37, %c0_38] : memref<1x32xf32, #tpu.memory_space<vmem>>, vector<1x32xf32>
      %78 = vector.broadcast %77 : vector<1x32xf32> to vector<16x32xf32>
      %79 = arith.addf %76, %78 : vector<16x32xf32>
      %80 = arith.truncf %79 : vector<16x32xf32> to vector<16x32xbf16>
      %c0_39 = arith.constant 0 : index
      %c0_40 = arith.constant 0 : index
      %81 = vector.load %arg10[%c0_39, %c0_40] : memref<16x32xbf16, #tpu.memory_space<vmem>>, vector<16x32xbf16>
      tpu.vector_store %arg10[%c0_39, %c0_40], %80 {strides = array<i32>} : memref<16x32xbf16, #tpu.memory_space<vmem>>, vector<16x32xbf16>,
    } else {
    }
    %c0 = arith.constant 0 : index
    %c0_1 = arith.constant 0 : index
    %3 = vector.load %arg10[%c0, %c0_1] : memref<16x32xbf16, #tpu.memory_space<vmem>>, vector<16x32xbf16>
    %c0_2 = arith.constant 0 : index
    %c0_3 = arith.constant 0 : index
    %4 = vector.load %arg7[%c0_2, %c0_3] : memref<256x32xbf16, #tpu.memory_space<vmem>>, vector<256x32xbf16>
    %cst = arith.constant dense<0.000000e+00> : vector<16x256xf32>
    %5 = tpu.matmul %3, %4, %cst {dimension_numbers = #tpu.dot_dimension_numbers<[1], [1], [0], [0], [0, 0, 1, 0], [], []>} : vector<16x32xbf16>, vector<256x32xbf16>, vector<16x256xf32> -> vector<16x256xf32>
    %c0_4 = arith.constant 0 : index
    %c0_5 = arith.constant 0 : index
    %6 = vector.load %arg8[%c0_4, %c0_5] : memref<1x256xf32, #tpu.memory_space<vmem>>, vector<1x256xf32>
    %7 = vector.broadcast %6 : vector<1x256xf32> to vector<16x256xf32>
    %8 = arith.addf %5, %7 : vector<16x256xf32>
    %c0_6 = arith.constant 0 : index
    %c0_7 = arith.constant 0 : index
    %9 = vector.load %arg9[%c0_6, %c0_7] : memref<16x256xf32, #tpu.memory_space<vmem>>, vector<16x256xf32>
    tpu.vector_store %arg9[%c0_6, %c0_7], %8 {strides = array<i32>} : memref<16x256xf32, #tpu.memory_space<vmem>>, vector<16x256xf32>,
    return
  }
  func.func @transform_0(%arg0: i32, %arg1: i32) -> (i32, i32) {
    %c0_i32 = arith.constant 0 : i32
    %c0_i32_0 = arith.constant 0 : i32
    return %arg0, %c0_i32 : i32, i32
  }
  func.func @transform_1(%arg0: i32, %arg1: i32) -> (i32, i32) {
    %c0_i32 = arith.constant 0 : i32
    %c0_i32_0 = arith.constant 0 : i32
    %c0_i32_1 = arith.constant 0 : i32
    return %c0_i32, %c0_i32_0 : i32, i32
  }
  func.func @transform_2(%arg0: i32, %arg1: i32) -> (i32, i32) {
    %c0_i32 = arith.constant 0 : i32
    %c0_i32_0 = arith.constant 0 : i32
    %c0_i32_1 = arith.constant 0 : i32
    return %c0_i32, %c0_i32_0 : i32, i32
  }
  func.func @transform_3(%arg0: i32, %arg1: i32) -> (i32, i32) {
    %c0_i32 = arith.constant 0 : i32
    %c0_i32_0 = arith.constant 0 : i32
    %c0_i32_1 = arith.constant 0 : i32
    return %c0_i32, %c0_i32_0 : i32, i32
  }
  func.func @transform_4(%arg0: i32, %arg1: i32) -> (i32, i32) {
    %c0_i32 = arith.constant 0 : i32
    %c0_i32_0 = arith.constant 0 : i32
    %c0_i32_1 = arith.constant 0 : i32
    return %c0_i32, %c0_i32_0 : i32, i32
  }
  func.func @transform_5(%arg0: i32, %arg1: i32) -> (i32, i32) {
    %c0_i32 = arith.constant 0 : i32
    %c0_i32_0 = arith.constant 0 : i32
    return %arg1, %c0_i32 : i32, i32
  }
  func.func @transform_6(%arg0: i32, %arg1: i32) -> (i32, i32) {
    %c0_i32 = arith.constant 0 : i32
    %c0_i32_0 = arith.constant 0 : i32
    return %c0_i32, %arg1 : i32, i32
  }
  func.func @transform_7(%arg0: i32, %arg1: i32) -> (i32, i32) {
    %c0_i32 = arith.constant 0 : i32
    return %arg0, %arg1 : i32, i32
  }
}

</mosaic_0001>

<bundles_post_ra>
// kernel: tpu_custom_call.1
= control target key start
LH: loop header
LB: loop body
LE: loop exit
PB: predicated region body
PF: predicated region fallthrough
CT: control target
= control target key end

     0   :  { %vm45_vm0 = vcmask 261120   ;;  %s776_s0 = inlined_call_operand.vmem [shape: f32[16,32], index: 0, kind: input, shape index: {}]   ;;  %s777_s1 = inlined_call_operand.vmem [shape: f32[32,32], index: 1, kind: input, shape index: {}]   ;;  %s778_s2 = inlined_call_operand.vmem [shape: f32[1,32], index: 2, kind: input, shape index: {}]   ;;  %s779_s3 = inlined_call_operand.vmem [shape: f32[1,32], index: 3, kind: input, shape index: {}]   ;;  %s780_s4 = inlined_call_operand.vmem [shape: f32[1,32], index: 4, kind: input, shape index: {}]   ;;  %s781_s5 = inlined_call_operand.vmem [shape: bf16[256,32], index: 5, kind: input, shape index: {}]   ;;  %s782_s6 = inlined_call_operand.vmem [shape: f32[1,256], index: 6, kind: input, shape index: {}]   ;;  %s783_s7 = inlined_call_operand.hbm [shape: f32[16,256], index: 7, kind: output, shape index: {}]  }
   0x1   :  { %v34_v0 = vld [vmem:[%s777_s1] sm:$0xff]  ;;  %v35_v1 = vld [vmem:[%s777_s1 + $0x8] sm:$0xff]  ;;  %v36_v2 = vld [vmem:[%s777_s1 + $0x10] sm:$0xff] }
   0x2   :  { %v541_v3 = vpack.c.bf16 %v35_v1, %v34_v0  ;;  %vm542_vm1 = vmpackc.low %vm45_vm0, %vm45_vm0  ;;  %v37_v4 = vld [vmem:[%s777_s1 + $0x18] sm:$0xff]  ;;  %v32_v5 = vld [vmem:[%s776_s0] sm:$0xff] }
   0x3   :  { %v547_v6 = vpack.c.bf16 %v37_v4, %v36_v2  ;;  %538 = vmatprep.mubr.msk.f32.mxu0 %vm45_vm0, %v32_v5 }
   0x4   :  { %543 = vmatprep.subr.msk.bf16.mxu0 %vm542_vm1, %v541_v3 }
   0x5   :  { %546 = vmatpush3.bf16.xpose.msk.msra.mxu0 %vm542_vm1, %v541_v3 }
   0x6   :  { %549 = vmatprep.subr.msk.bf16.mxu0 %vm542_vm1, %v547_v6 }
   0xd   :  { %552 = vmatpush3.bf16.xpose.msk.msra.mxu0 %vm542_vm1, %v547_v6 }
   0xe   :  { %12 = vsyncpa [#allocation4], 0  ;;  %v33_v7 = vld [vmem:[%s776_s0 + $0x8] sm:$0xff]  ;;  %v480_v8 = vld [vmem:[%s778_s2] ss:$0 sm:$0xff] }
   0xf   :  { %v564_v1 = vld [vmem:[%s781_s5 + $0x40] sm:$0xff]   ;;  %v566_v3 = vld [vmem:[%s781_s5 + $0x48] sm:$0xff]  }
  0x10   :  { %v565_v2 = vld [vmem:[%s781_s5] sm:$0xff]   ;;  %553 = vmatprep.subr.msk.bf16.mxu1 %vm45_vm0, %v564_v1  ;;  %v567_v5 = vld [vmem:[%s781_s5 + $0x8] sm:$0xff]  }
  0x11   :  { %v370_v4 = vsel %vm45_vm0, %v565_v2, 0  ;;  %v373_v6 = vsel %vm45_vm0, %v567_v5, 0 }
  0x12   :  { %513 = vmatpush3.bf16.xpose.msra.mxu1 %v370_v4 }
  0x13   :  { %554 = vmatprep.subr.msk.bf16.mxu1 %vm45_vm0, %v566_v3 }
  0x14   :  { %539 = vmatmul.mubr.msk.f32.vlgmr.msra.gmra.mrb[0].mxu0 %vm45_vm0, %v33_v7  ;;  %v568_v7 = vld [vmem:[%s781_s5 + $0x50] sm:$0xff]  }
  0x1a   :  { %515 = vmatpush3.bf16.xpose.msra.mxu1 %v373_v6 }
  0x1b   :  { %555 = vmatprep.subr.msk.bf16.mxu1 %vm45_vm0, %v568_v7 }
  0xe7   :  { %v540_v9 = vpop.f32.mrb[0].mxu0 }
  0xe8   :  { %v136_v10 = vadd.f32 %v540_v9, %v480_v8  ;;  %v130_v11 = vpop.f32.mrb[1].mxu0 }
  0xe9   :  { %v131_v12 = vadd.f32 %v480_v8, %v130_v11  ;;  %v569_v8 = vld [vmem:[%s781_s5 + $0x10] sm:$0xff]   ;;  %v571_v11 = vld [vmem:[%s781_s5 + $0x18] sm:$0xff]  }
  0xea   :  { %v142_v13 = vmul.f32 0.70710677, %v136_v10  ;;  %v140_v60 = vmul.f32 0.5, %v136_v10  ;;  %v376_v9 = vsel %vm45_vm0, %v569_v8, 0  ;;  %v570_v10 = vld [vmem:[%s781_s5 + $0x58] sm:$0xff]  }
  0xeb   :  { %v141_v14 = vmul.f32 0.70710677, %v131_v12  ;;  %v139_v57 = vmul.f32 0.5, %v131_v12  ;;  %517 = vmatpush3.bf16.xpose.msra.mxu1 %v376_v9  ;;  %v379_v12 = vsel %vm45_vm0, %v571_v11, 0 }
  0xec   :  { %v144_v15 = vand.u32 2147483647, %v142_v13  ;;  %vm184_vm2 = vcmp.ge.f32.partialorder %v142_v13, 0.0  ;;  %556 = vmatprep.subr.msk.bf16.mxu1 %vm45_vm0, %v570_v10 }
  0xed   :  { %v143_v16 = vand.u32 2147483647, %v141_v14  ;;  %vm183_vm3 = vcmp.ge.f32.partialorder %v141_v14, 0.0 }
  0xee   :  { %v146_v17 = vmul.f32 0.3275911, %v144_v15  ;;  %v172_v21 = vsub.f32 0.0, %v144_v15 }
  0xef   :  { %v145_v18 = vmul.f32 0.3275911, %v143_v16  ;;  %v171_v22 = vsub.f32 0.0, %v143_v16 }
  0xf0   :  { %v148_v19 = vadd.f32 1.0, %v146_v17  ;;  %v174_v24 = vmul.f32 %v172_v21, %v144_v15 }
  0xf1   :  { %v147_v20 = vadd.f32 1.0, %v145_v18  ;;  %v173_v26 = vmul.f32 %v171_v22, %v143_v16 }
  0xf2   :  { %580 = vrcp.f32 %v148_v19  ;;  %v177_v30 = vmul.f32 1.442695, %v174_v24  ;;  %v573_v24 = vld [vmem:[%s781_s5 + $0x20] sm:$0xff]  }
  0xf3   :  { %582 = vrcp.f32 %v147_v20  ;;  %v175_v32 = vmul.f32 1.442695, %v173_v26  ;;  %519 = vmatpush3.bf16.xpose.msra.mxu1 %v379_v12  ;;  %v574_v26 = vld [vmem:[%s781_s5 + $0x68] sm:$0xff]  }
  0xf4   :  { %584 = vpow2.f32 %v177_v30  ;;  %v577_v30 = vld [vmem:[%s781_s5 + $0x30] sm:$0xff]  }
  0xf5   :  { %586 = vpow2.f32 %v175_v32  ;;  %v578_v32 = vld [vmem:[%s781_s5 + $0x78] sm:$0xff]  }
  0xfc   :  { %v581_v23 = vpop.eup %580 }
  0xfd   :  { %v583_v25 = vpop.eup %582  ;;  %v154_v27 = vmul.f32 1.0614054, %v581_v23 }
  0xfe   :  { %v153_v28 = vmul.f32 1.0614054, %v583_v25  ;;  %v585_v46 = vpop.eup %584 }
  0xff   :  { %v156_v29 = vadd.f32 -1.4531521, %v154_v27  ;;  %v587_v48 = vpop.eup %586  ;;  %v575_v27 = vld [vmem:[%s781_s5 + $0x28] sm:$0xff]  }
 0x100   :  { %v155_v31 = vadd.f32 -1.4531521, %v153_v28  ;;  %v385_v28 = vsel %vm45_vm0, %v575_v27, 0 }
 0x101   :  { %v158_v33 = vmul.f32 %v581_v23, %v156_v29  ;;  %v576_v29 = vld [vmem:[%s781_s5 + $0x70] sm:$0xff]  }
 0x102   :  { %v157_v34 = vmul.f32 %v583_v25, %v155_v31  ;;  %v388_v31 = vsel %vm45_vm0, %v577_v30, 0 }
 0x103   :  { %v160_v35 = vadd.f32 1.4214138, %v158_v33  ;;  %v579_v33 = vld [vmem:[%s781_s5 + $0x38] sm:$0xff]  }
 0x104   :  { %v159_v36 = vadd.f32 1.4214138, %v157_v34  ;;  %v391_v34 = vsel %vm45_vm0, %v579_v33, 0 }
 0x105   :  { %v162_v37 = vmul.f32 %v581_v23, %v160_v35 }
 0x106   :  { %v161_v38 = vmul.f32 %v583_v25, %v159_v36 }
 0x107   :  { %v164_v39 = vadd.f32 -0.28449672, %v162_v37 }
 0x108   :  { %v163_v40 = vadd.f32 -0.28449672, %v161_v38 }
 0x109   :  { %v166_v41 = vmul.f32 %v581_v23, %v164_v39 }
 0x10a   :  { %v165_v42 = vmul.f32 %v583_v25, %v163_v40 }
 0x10b   :  { %v168_v43 = vadd.f32 0.2548296, %v166_v41 }
 0x10c   :  { %v167_v44 = vadd.f32 0.2548296, %v165_v42 }
 0x10d   :  { %v170_v45 = vmul.f32 %v581_v23, %v168_v43  ;;  %v572_v23 = vld [vmem:[%s781_s5 + $0x60] sm:$0xff]  }
 0x10e   :  { %v169_v47 = vmul.f32 %v583_v25, %v167_v44  ;;  %557 = vmatprep.subr.msk.bf16.mxu1 %vm45_vm0, %v572_v23  ;;  %v382_v25 = vsel %vm45_vm0, %v573_v24, 0  ;;  %v487_v43 = vld [vmem:[%s779_s3] ss:$0 sm:$0xff] }
 0x10f   :  { %v180_v49 = vmul.f32 %v585_v46, %v170_v45  ;;  %521 = vmatpush3.bf16.xpose.msra.mxu1 %v382_v25 }
 0x110   :  { %v179_v50 = vmul.f32 %v587_v48, %v169_v47  ;;  %558 = vmatprep.subr.msk.bf16.mxu1 %vm45_vm0, %v574_v26  ;;  %v488_v47 = vld [vmem:[%s780_s4] ss:$0 sm:$0xff]  ;;  %s616_s4 = smov [#allocation3]  }
 0x111   :  { %v182_v51 = vsub.f32 1.0, %v180_v49  ;;  %s469_s22 = sshll.u32 %s616_s4, 4  ;;  %s470_s22 = int_to_ptr.vmem [resolvable:$true] %s469_s22 }
 0x112   :  { %v181_v52 = vsub.f32 1.0, %v179_v50  ;;  %s592_s23 = scalar_lea.vmem %s470_s22, 512  ;;  %p597_p1 = scmp.lt.s32.totalorder %s470_s22, %s470_s22 }
 0x113   :  { %v186_v53 = vsub.f32 0.0, %v182_v51  ;;  %p593_p0 = scmp.ne.s32.totalorder %s470_s22, %s592_s23  ;;  %p598_p2 = scmp.lt.s32.totalorder %s592_s23, %s592_s23 }
 0x114   :  { %v185_v54 = vsub.f32 0.0, %v181_v52 }
 0x115   :  { %v188_v55 = vsel %vm184_vm2, %v182_v51, %v186_v53  ;;  %v275_v53 = vlaneseq  ;;  %p599_p3 = por %p598_p2, %p597_p1 }
 0x116   :  { %v187_v56 = vsel %vm183_vm3, %v181_v52, %v185_v54  ;;  %v190_v59 = vadd.f32 1.0, %v188_v55 }
 0x117   :  { %v189_v58 = vadd.f32 1.0, %v187_v56  ;;  %523 = vmatpush3.bf16.xpose.msra.mxu1 %v385_v28  ;;  %v276_v54 = vshrl.u32 %v275_v53, 7  ;;  %v273_v56 = vld [vmem:[%s782_s6] sm:$0x3]  ;;  %p600_p4 = pnand %p599_p3, %p593_p0 }
 0x118   :  { %v192_v63 = vmul.f32 %v190_v59, %v140_v60  ;;  %559 = vmatprep.subr.msk.bf16.mxu1 %vm45_vm0, %v576_v29 }
 0x119   :  { %v191_v61 = vmul.f32 %v189_v58, %v139_v57  ;;  %v277_v55 = vsub.s32 0, %v276_v54  ;;  %v281_v57 = vsub.s32 1, %v276_v54 }
 0x11a   :  { %v196_v0 = vsel %vm45_vm0, %v192_v63, 0.0 }
 0x11b   :  { %v193_v62 = vsel %vm45_vm0, %v191_v61, 0.0  ;;  %v278_v58 = vrot.slane %v273_v56, %v277_v55  ;;  %v282_v59 = vrot.slane %v273_v56, %v281_v57 }
 0x11c   :  { %194 = vadd.xlane.f32.xlu0 %v193_v62 }
 0x11f   :  { %525 = vmatpush3.bf16.xpose.msra.mxu1 %v388_v31 }
 0x120   :  { %197 = vadd.xlane.f32.xlu0 %v196_v0  ;;  %560 = vmatprep.subr.msk.bf16.mxu1 %vm45_vm0, %v578_v32 }
 0x127   :  { %527 = vmatpush3.bf16.xpose.msra.mxu1 %v391_v34 }
 0x1a9   :  { %v195_v13 = vpop.xlane.xlu0 %194 }
 0x1aa   :  { %v200_v14 = vmul.f32 0.03125, %v195_v13 }
 0x1ac   :  { %v202_v15 = vsub.f32 %v191_v61, %v200_v14 }
 0x1ad   :  { %v198_v16 = vpop.xlane.xlu0 %197 }
 0x1ae   :  { %v201_v17 = vmul.f32 0.03125, %v198_v16  ;;  %v204_v18 = vmul.f32 %v202_v15, %v202_v15 }
 0x1b0   :  { %v203_v19 = vsub.f32 %v192_v63, %v201_v17  ;;  %v206_v20 = vsel %vm45_vm0, %v204_v18, 0.0 }
 0x1b1   :  { %207 = vadd.xlane.f32.xlu1 %v206_v20 }
 0x1b2   :  { %v205_v21 = vmul.f32 %v203_v19, %v203_v19 }
 0x1b4   :  { %v209_v22 = vsel %vm45_vm0, %v205_v21, 0.0 }
 0x1b5   :  { %210 = vadd.xlane.f32.xlu1 %v209_v22 }
 0x23e   :  { %v208_v35 = vpop.xlane.xlu1 %207 }
 0x23f   :  { %v212_v36 = vmul.f32 0.03125, %v208_v35 }
 0x241   :  { %v214_v37 = vadd.f32 1e-12, %v212_v36 }
 0x242   :  { %v211_v38 = vpop.xlane.xlu1 %210 }
 0x243   :  { %588 = vrsqrt.f32 %v214_v37  ;;  %v213_v39 = vmul.f32 0.03125, %v211_v38 }
 0x245   :  { %v215_v40 = vadd.f32 1e-12, %v213_v39 }
 0x247   :  { %590 = vrsqrt.f32 %v215_v40 }
 0x24d   :  { %v589_v41 = vpop.eup %588 }
 0x24e   :  { %v218_v42 = vmul.f32 %v589_v41, %v202_v15 }
 0x250   :  { %v227_v45 = vmul.f32 %v487_v43, %v218_v42 }
 0x251   :  { %v591_v44 = vpop.eup %590 }
 0x252   :  { %v219_v46 = vmul.f32 %v591_v44, %v203_v19  ;;  %v236_v49 = vadd.f32 %v488_v47, %v227_v45 }
 0x254   :  { %v228_v48 = vmul.f32 %v487_v43, %v219_v46 }
 0x256   :  { %v237_v50 = vadd.f32 %v488_v47, %v228_v48 }
 0x258   :  { %v238_v51 = vpack.c.bf16 %v237_v50, %v236_v49 }
 0x25a   :  { %239 = vst.msk [vmem:[#allocation2] sm:$0xff] %vm45_vm0, %v238_v51 }
 0x261   :  { %v240_v52 = vld [vmem:[#allocation2] sm:$0xff] }
 0x262   :  { %528 = vmatprep.mubr.msk.bf16.mxu1 %vm45_vm0, %v240_v52 }
 0x263   :  { %529 = vmatmul.mubr.msk.bf16.vlgmr.msra.gmra.mrb[0].mxu1 %vm45_vm0, %v240_v52 }
 0x336   :  { %v451_v60 = vpop.f32.mrb[0].mxu1 }
 0x337   :  { %v452_v61 = vadd.f32 %v451_v60, %v278_v58  ;;  %v453_v62 = vpop.f32.mrb[1].mxu1 }
 0x338   :  { %v454_v63 = vadd.f32 %v453_v62, %v282_v59  ;;  %v455_v0 = vpop.f32.mrb[2].mxu1 }
 0x339   :  { %460 = vst [vmem:[#allocation3] sm:$0xff] %v452_v61  ;;  %v456_v1 = vadd.f32 %v455_v0, %v278_v58  ;;  %v457_v2 = vpop.f32.mrb[3].mxu1 }
 0x33a   :  { %461 = vst [vmem:[#allocation3 + $0x8] sm:$0xff] %v454_v63  ;;  %v458_v3 = vadd.f32 %v457_v2, %v282_v59 }
 0x33b   :  { %462 = vst [vmem:[#allocation3 + $0x10] sm:$0xff] %v456_v1 }
 0x33c   :  { %463 = vst [vmem:[#allocation3 + $0x18] sm:$0xff] %v458_v3 }
 0x33d   :  { %603 = shalt.err (!%p600_p4)
}
 0x33e   :  { %s604_s25 = scalar_lea.hbm %s783_s7, 512 }
 0x33f   :  { %p605_p5 = scmp.ne.s32.totalorder %s783_s7, %s604_s25  ;;  %p608_p6 = scmp.lt.u32.totalorder %s604_s25, %s783_s7 }
 0x341   :  { %p610_p7 = pnand %p608_p6, %p605_p5 }
 0x343   :  { %613 = shalt.err (!%p610_p7)
}
 0x344   :  { %s617_s30 = smov 256   ;;  %s618_s8 = smov 16  }
 0x345   :  { %475 = dma.vmem_to_hbm [thread:$0]  %s470_s22, 512, %s783_s7, [#allocation4], %s617_s30, %s617_s30, %s618_s8  }
 0x346   :  { %614 = dma.done.wait [#allocation4], 512  }
 0x347   :  { %615 = vsyncadd [#allocation4], 4294966784 }
 0x348   :  { %479 = vsyncpa [#allocation4], 1 }

</bundles_post_ra>
